<compile_context>
chip_gen: v5e
topology: v5e:2x2
jax: 0.10.0
libtpu: 0.0.40
codegen_flags: <defaults>
</compile_context>

<pallas_src>
import numpy as np

import jax
import jax.numpy as jnp
from jax.experimental import pallas as pl
from jax.experimental.pallas import tpu as pltpu


def pe_add_kernel(x_ref, pe_ref, o_ref):
    """x_ref/o_ref: (Bt, Ct); pe_ref: (1, Ct), broadcast over the batch rows."""
    o_ref[...] = x_ref[...] + pe_ref[...]


def _lane_chunk(LD, target=2048):
    """Largest multiple of 128 that divides LD, capped at `target` f32 lanes.

    Falls back to the full row when LD is small or not a multiple of 128
    (still correct; stores are simply masked in that case)."""
    if LD % 128 != 0 or LD <= target:
        return LD
    c = (target // 128) * 128
    while c > 128 and LD % c != 0:
        c -= 128
    return c


def _batch_tile(B, Ct, itemsize, budget_bytes=2 * 1024 * 1024):
    """Batch rows per block.

    Whole batch when a (B, Ct) block is under ~2 MiB (single block dim == full
    array dim, always legal).  Otherwise the largest multiple of 8 (full f32
    sublane occupancy, legal partial block) that divides B and stays under
    budget, so 2x(x) + 2x(out) double-buffered + resident pe <= ~8 MiB,
    comfortably inside the 16 MiB v5e scoped-VMEM default."""
    max_rows = max(1, budget_bytes // max(1, Ct * itemsize))
    if B <= max_rows:
        return B
    bt = 8 * (max_rows // 8)
    while bt >= 8:
        if B % bt == 0:
            return bt
        bt -= 8
    return B  # no aligned divisor: take the whole batch in one block


def sinusoidal_positional_encoding(x, encoding):
    """Forward pass of SinusoidalPositionalEncoding (dropout = identity).

    x        : (B, L, D)
    encoding : (max_seq_len, D) precomputed buffer, L <= max_seq_len
    returns  : (B, L, D) == x + encoding[:L][None]
    """
    B, L, D = x.shape
    Lmax, De = encoding.shape
    assert De == D and L <= Lmax, "need d_embed match and n_token <= max_seq_len"

    LD = L * D
    # Flatten (L, D) -> L*D so the trailing (lane) axis is wide; here 512, a
    # multiple of 128 -> unmasked lane-dense loads/stores.
    x2 = x.reshape(B, LD)
    pe2 = encoding[:L].astype(x.dtype).reshape(1, LD)

    # Tiling: collapses to grid (1, 1) at small sizes (single step, no per-step
    # overhead); chunks lanes/batch only when the data is large enough to need
    # pipelining.  Chunk axis OUTER, batch axis INNER so the PE block index is
    # constant across consecutive steps and stays VMEM-resident.
    Ct = _lane_chunk(LD)
    Bt = _batch_tile(B, Ct, np.dtype(x.dtype).itemsize)
    grid = (LD // Ct, B // Bt)

    out = pl.pallas_call(
        pe_add_kernel,
        out_shape=jax.ShapeDtypeStruct((B, LD), x.dtype),
        grid_spec=pltpu.PrefetchScalarGridSpec(
            num_scalar_prefetch=0,
            grid=grid,
            in_specs=[
                pl.BlockSpec((Bt, Ct), lambda c, b: (b, c)),
                # PE indexed only by the chunk axis -> resident across batch tiles.
                pl.BlockSpec((1, Ct), lambda c, b: (0, c)),
            ],
            out_specs=pl.BlockSpec((Bt, Ct), lambda c, b: (b, c)),
        ),
        compiler_params=pltpu.CompilerParams(
            # Plain "parallel" has near-zero codegen impact and does NOT shard
            # across v7x TensorCores; use "arbitrary" to keep the sequential
            # PE-residency behavior explicit.  Switch the batch axis to
            # pltpu.CORE_PARALLEL only when bytes-per-core reach O(100 KB+).
            dimension_semantics=("arbitrary", "arbitrary"),
        ),
    )(x2, pe2)
    return out.reshape(B, L, D)


def build_sinusoidal_encoding(max_seq_len, d_embed):
    """Mirrors SinusoidalPositionalEncoding.__init__ (d_embed must be even)."""
    assert d_embed % 2 == 0, "reference init assumes even d_embed"
    positions = np.arange(max_seq_len, dtype=np.float32)[:, None]             # (L, 1)
    denominators = np.exp(
        np.arange(0, d_embed, 2, dtype=np.float32) * (np.log(1e-4) / d_embed)
    )[None, :]                                                                # (1, D/2)
    m = positions @ denominators                                              # (L, D/2)
    enc = np.zeros((max_seq_len, d_embed), dtype=np.float32)
    enc[:, 0::2] = np.sin(m)
    enc[:, 1::2] = np.cos(m[:, : d_embed // 2])
    return jnp.asarray(enc)


def reference(x, encoding):
    L = x.shape[1]
    return x + encoding[:L][None]


if __name__ == "__main__":
    B, max_seq_len, d_embed = 2, 16, 32

    key = jax.random.PRNGKey(0)
    x = jax.random.normal(key, (B, max_seq_len, d_embed), dtype=jnp.float32)
    # One-time "register_buffer" (hoisted out of the forward path).
    encoding = build_sinusoidal_encoding(max_seq_len, d_embed)

    out = sinusoidal_positional_encoding(x, encoding)
    out = jax.block_until_ready(out)

    ref = reference(x, encoding)
    np.testing.assert_allclose(np.asarray(out), np.asarray(ref), rtol=1e-6, atol=1e-6)
    print("KERNEL_OK")
</pallas_src>

<mosaic_0001>
module attributes {stable_mosaic.version = 11 : i64} {
  func.func @pe_add_kernel(%arg0: i32, %arg1: i32, %arg2: memref<2x512xf32, #tpu.memory_space<vmem>>, %arg3: memref<1x512xf32, #tpu.memory_space<vmem>>, %arg4: memref<2x512xf32, #tpu.memory_space<vmem>>) attributes {dimension_semantics = [#tpu.dimension_semantics<arbitrary>, #tpu.dimension_semantics<arbitrary>], iteration_bounds = array<i64: 1, 1>, scalar_prefetch = 0 : i64, scratch_operands = 0 : i64, tpu.core_type = #tpu.core_type<tc>, window_params = [{transform_indices = @transform_0, window_bounds = array<i64: 2, 512>}, {transform_indices = @transform_1, window_bounds = array<i64: 1, 512>}, {transform_indices = @transform_2, window_bounds = array<i64: 2, 512>}]} {
    %c0 = arith.constant 0 : index
    %c0_0 = arith.constant 0 : index
    %0 = vector.load %arg2[%c0, %c0_0] : memref<2x512xf32, #tpu.memory_space<vmem>>, vector<2x512xf32>
    %c0_1 = arith.constant 0 : index
    %c0_2 = arith.constant 0 : index
    %1 = vector.load %arg3[%c0_1, %c0_2] : memref<1x512xf32, #tpu.memory_space<vmem>>, vector<1x512xf32>
    %2 = vector.broadcast %1 : vector<1x512xf32> to vector<2x512xf32>
    %3 = arith.addf %0, %2 : vector<2x512xf32>
    %c0_3 = arith.constant 0 : index
    %c0_4 = arith.constant 0 : index
    %4 = vector.load %arg4[%c0_3, %c0_4] : memref<2x512xf32, #tpu.memory_space<vmem>>, vector<2x512xf32>
    tpu.vector_store %arg4[%c0_3, %c0_4], %3 {strides = array<i32>} : memref<2x512xf32, #tpu.memory_space<vmem>>, vector<2x512xf32>,
    return
  }
  func.func @transform_0(%arg0: i32, %arg1: i32) -> (i32, i32) {
    %c0_i32 = arith.constant 0 : i32
    return %arg1, %arg0 : i32, i32
  }
  func.func @transform_1(%arg0: i32, %arg1: i32) -> (i32, i32) {
    %c0_i32 = arith.constant 0 : i32
    %c0_i32_0 = arith.constant 0 : i32
    return %c0_i32, %arg0 : i32, i32
  }
  func.func @transform_2(%arg0: i32, %arg1: i32) -> (i32, i32) {
    %c0_i32 = arith.constant 0 : i32
    return %arg1, %arg0 : i32, i32
  }
}

</mosaic_0001>

<bundles_post_ra>
// kernel: tpu_custom_call.1
= control target key start
LH: loop header
LB: loop body
LE: loop exit
PB: predicated region body
PF: predicated region fallthrough
CT: control target
= control target key end

     0   :  { %7 = vsyncpa [#allocation3], 0  ;;  %s185_s0 = inlined_call_operand.hbm [shape: f32[2,512], index: 0, kind: input, shape index: {}]   ;;  %s186_s1 = inlined_call_operand.hbm [shape: f32[1,512], index: 1, kind: input, shape index: {}]   ;;  %s187_s2 = inlined_call_operand.hbm [shape: f32[2,512], index: 2, kind: output, shape index: {}]  }
   0x1   :  { %8 = vsyncpa [#allocation6], 0 }
   0x2   :  { %9 = vsyncpa [#allocation4], 0  ;;  %s15_s11 = sshll.u32 %s185_s0, 4  ;;  %s158_s12 = smov [#allocation2]   ;;  %s16_s11 = int_to_ptr.hbm [resolvable:$true] %s15_s11 }
   0x3   :  { %s17_s13 = sshll.u32 %s158_s12, 4  ;;  %s26_s16 = sshll.u32 %s186_s1, 4  ;;  %s18_s13 = int_to_ptr.vmem [resolvable:$true] %s17_s13  ;;  %s27_s16 = int_to_ptr.hbm [resolvable:$true] %s26_s16 }
   0x4   :  { %20 = dma.hbm_to_vmem [thread:$0]  %s16_s11, 128, %s18_s13, [#allocation3]  }
   0x5   :  { %s159_s17 = smov [#allocation5]  }
   0x6   :  { %s28_s18 = sshll.u32 %s159_s17, 4  ;;  %s29_s18 = int_to_ptr.vmem [resolvable:$true] %s28_s18 }
   0x7   :  { %31 = dma.hbm_to_vmem [thread:$0]  %s27_s16, 64, %s29_s18, [#allocation6]  }
   0x8   :  { %152 = dma.done.wait [#allocation3], 128  }
   0x9   :  { %153 = vsyncadd [#allocation3], 4294967168 }
   0xa   :  { %154 = dma.done.wait [#allocation6], 64  }
   0xb   :  { %155 = vsyncadd [#allocation6], 4294967232  ;;  %v41_v0 = vld [vmem:[#allocation5] sm:$0xf]  ;;  %vm50_vm0 = vcmask 1041408   ;;  %vm52_vm1 = vcmask 1045508  }
   0xc   :  { %v43_v1 = vperm.slane %v41_v0, 0  ;;  %v44_v2 = vperm.slane %v41_v0, 1  ;;  %v45_v3 = vperm.slane %v41_v0, 2  ;;  %v46_v4 = vperm.slane %v41_v0, 3  ;;  %v40_v8 = vld [vmem:[#allocation2] sm:$0xff]  ;;  %s160_s0 = smov [#allocation7]  }
   0xd   :  { %vm54_vm2 = vcmask 1043456   ;;  %s64_s1 = sshll.u32 %s160_s0, 4  ;;  %s66_s21 = sshll.u32 %s187_s2, 4  ;;  %s65_s1 = int_to_ptr.vmem [resolvable:$true] %s64_s1  ;;  %s67_s21 = int_to_ptr.hbm [resolvable:$true] %s66_s21 }
   0xe   :  { %v47_v5 = vrot.slane %v44_v2, 6  ;;  %v48_v6 = vrot.slane %v45_v3, 4  ;;  %v49_v7 = vrot.slane %v46_v4, 2 }
  0x10   :  { %v51_v9 = vsel %vm50_vm0, %v43_v1, %v47_v5  ;;  %v53_v10 = vsel %vm52_vm1, %v48_v6, %v49_v7 }
  0x11   :  { %v55_v11 = vsel %vm54_vm2, %v51_v9, %v53_v10 }
  0x12   :  { %v57_v12 = vadd.f32 %v55_v11, %v40_v8 }
  0x14   :  { %58 = vst [vmem:[#allocation7] sm:$0xff] %v57_v12 }
  0x15   :  { %69 = dma.vmem_to_hbm [thread:$0]  %s65_s1, 128, %s67_s21, [#allocation4]  }
  0x16   :  { %156 = dma.done.wait [#allocation4], 128  }
  0x17   :  { %157 = vsyncadd [#allocation4], 4294967168 }
  0x18   :  { %74 = vsyncpa [#allocation3], 1 }
  0x19   :  { %75 = vsyncpa [#allocation6], 1 }
  0x1a   :  { %76 = vsyncpa [#allocation4], 1 }

</bundles_post_ra>
